<compile_context>
chip_gen: v7x
topology: tpu7x:2x2x1
jax: 0.10.0
libtpu: 0.0.40
codegen_flags: <defaults>
</compile_context>

<pallas_src>
import jax
import jax.numpy as jnp
from jax.experimental import pallas as pl
from jax.experimental.pallas import tpu as pltpu

HIDDEN = 8
INPUT = 6

# Parameter-slab row layout (all rows are 8*HIDDEN = 64 lanes wide):
#   rows 0:6   -> Wproj  (INPUT, 8H)   input projection, layer-1 lanes zero
#   row  6     -> bias   (8H,)         [b_ih0+b_hh0 | b_ih1+b_hh1] interleaved
#   row  7     -> lanes 0:H = W_lin, lane H = b_lin
#   rows 8:24  -> Wblk   (2H, 8H)      rows [h0|h1], cols interleaved gates
_SLAB_ROWS = 24


def _make_kernel(B, T):
    H = HIDDEN
    G2 = 2 * H      # fused state / per-gate slice width (16)
    G8 = 8 * H      # full fused gate width (64)

    def kernel(x_ref, p_ref, out_ref):
        # ---- unpack the single parameter slab (static value slices) -------
        p = p_ref[...]                              # (24, 64)
        wproj = p[0:INPUT, :]                       # (6, 64)
        bias_all = p[INPUT:INPUT + 1, :]            # (1, 64)
        head_row = p[INPUT + 1:INPUT + 2, :]        # (1, 64)
        wlin = head_row[:, 0:H]                     # (1, 8)
        blin = head_row[:, H:H + 1]                 # (1, 1)
        wblk = p[8:8 + 2 * H, :]                    # (16, 64)

        # ---- ONE fused input projection for ALL time steps ----------------
        # x_ref is time-major + flattened: rows t*B:(t+1)*B hold x_t.
        # proj[t*B:(t+1)*B, :] = [ x_t @ W_ih0 + b0 | b1 ]   (interleaved)
        xflat = x_ref[...]                                            # (T*B, 6)
        proj = jnp.dot(xflat, wproj,
                       preferred_element_type=jnp.float32) + bias_all  # (T*B, 64)

        # lanes 0:H of the fused (B, 2H) state are layer-0, lanes H:2H layer-1
        l0_mask = jax.lax.broadcasted_iota(jnp.int32, (B, G2), 1) < H

        def step(gates, c):
            # gates: (B, 64) = [i0 i1 | f0 f1 | g0 g1 | o0 o1]
            sig = jax.nn.sigmoid(gates)             # full-width EUP launch
            th = jnp.tanh(gates)                    # full-width EUP launch
            i = sig[:, 0 * G2:1 * G2]
            f = sig[:, 1 * G2:2 * G2]
            g = th[:, 2 * G2:3 * G2]
            o = sig[:, 3 * G2:4 * G2]
            c = f * c + i * g                       # fused [c0|c1] update
            h = o * jnp.tanh(c)                     # ONE (B,2H) tanh
            return h, c

        # ---- prologue: layer-0 at t = 0 (h = c = 0, so gates = proj[0]) ---
        gates0 = proj[0:B, :]
        sig = jax.nn.sigmoid(gates0)
        th = jnp.tanh(gates0)
        i = sig[:, 0 * G2:1 * G2]
        g = th[:, 2 * G2:3 * G2]
        o = sig[:, 3 * G2:4 * G2]
        c = jnp.where(l0_mask, i * g, 0.0)          # c1 stays exactly 0
        h = o * jnp.tanh(c)                         # h1 = o1 * tanh(0) = 0

        # ---- fused, software-pipelined recurrence (fully unrolled, T=8) ---
        # Iteration k computes layer-0 at time k+1 AND layer-1 at time k with
        # ONE (B,2H)@(2H,8H) matmul on the fused state.  At k = T-1 the
        # layer-0 half is dead (bias_all only) and simply ignored.
        for k in range(T):
            if k + 1 < T:
                bias_k = proj[(k + 1) * B:(k + 2) * B, :]   # (B, 64)
            else:
                bias_k = bias_all                           # (1, 64) broadcast
            gates = jnp.dot(h, wblk,
                            preferred_element_type=jnp.float32) + bias_k
            h, c = step(gates, c)

        # ---- head: last layer-1 hidden -> ReLU -> Linear(8->1) on the VPU -
        feat = jnp.maximum(h[:, H:G2], 0.0)                  # (B, H)
        out = jnp.sum(feat * wlin, axis=1, keepdims=True) + blin
        out_ref[...] = out.astype(out_ref.dtype)

    return kernel


@jax.jit
def my_model_forward(x, param_slab):
    """x: (B, T, INPUT) float32, batch-first (same as the PyTorch module)."""
    B, T, D = x.shape
    # Time-major + flattened so each time step is a contiguous B-row group;
    # this lets the kernel do the input projection in a single matmul.
    xflat = jnp.swapaxes(x, 0, 1).reshape(T * B, D)
    vmem = pl.BlockSpec(memory_space=pltpu.MemorySpace.VMEM)
    return pl.pallas_call(
        _make_kernel(B, T),
        out_shape=jax.ShapeDtypeStruct((B, 1), jnp.float32),
        in_specs=[vmem, vmem],      # 2 input DMAs: activations + param slab
        out_specs=vmem,
    )(xflat, param_slab)


def _interleave_cols(a0, a1):
    """Interleave per-gate column blocks: [i0|i1|f0|f1|g0|g1|o0|o1]."""
    H = HIDDEN
    parts = []
    for g in range(4):                      # PyTorch gate order: i, f, g, o
        parts.append(a0[..., g * H:(g + 1) * H])
        parts.append(a1[..., g * H:(g + 1) * H])
    return jnp.concatenate(parts, axis=-1)


def init_params(key):
    """PyTorch-style U(-1/sqrt(H), 1/sqrt(H)) init, then pack for the kernel."""
    H = HIDDEN
    k = 1.0 / jnp.sqrt(jnp.float32(H))
    keys = jax.random.split(key, 10)

    def u(rng, shape):
        return jax.random.uniform(rng, shape, jnp.float32, minval=-k, maxval=k)

    # Raw PyTorch-shaped parameters.
    w_ih0 = u(keys[0], (4 * H, INPUT))
    w_hh0 = u(keys[1], (4 * H, H))
    b_ih0 = u(keys[2], (4 * H,))
    b_hh0 = u(keys[3], (4 * H,))
    w_ih1 = u(keys[4], (4 * H, H))
    w_hh1 = u(keys[5], (4 * H, H))
    b_ih1 = u(keys[6], (4 * H,))
    b_hh1 = u(keys[7], (4 * H,))
    w_lin = u(keys[8], (1, H))
    b_lin = u(keys[9], (1,))

    # ---- packed kernel parameters (interleaved gate-column layout) --------
    wproj = _interleave_cols(w_ih0.T, jnp.zeros((INPUT, 4 * H), jnp.float32))
    bias_all = _interleave_cols((b_ih0 + b_hh0)[None, :],
                                (b_ih1 + b_hh1)[None, :])[0]        # (64,)
    wblk_h0 = _interleave_cols(w_hh0.T, w_ih1.T)                    # (8, 64)
    wblk_h1 = _interleave_cols(jnp.zeros((H, 4 * H), jnp.float32),
                               w_hh1.T)                             # (8, 64)
    wblk = jnp.concatenate([wblk_h0, wblk_h1], axis=0)              # (16, 64)

    slab = jnp.zeros((_SLAB_ROWS, 8 * H), jnp.float32)
    slab = slab.at[0:INPUT, :].set(wproj)
    slab = slab.at[INPUT, :].set(bias_all)
    slab = slab.at[INPUT + 1, 0:H].set(w_lin[0])
    slab = slab.at[INPUT + 1, H].set(b_lin[0])
    slab = slab.at[8:8 + 2 * H, :].set(wblk)

    raw = {
        "w_ih0": w_ih0, "w_hh0": w_hh0, "b_ih0": b_ih0, "b_hh0": b_hh0,
        "w_ih1": w_ih1, "w_hh1": w_hh1, "b_ih1": b_ih1, "b_hh1": b_hh1,
        "w_lin": w_lin, "b_lin": b_lin,
    }
    return slab, raw


def _reference_forward(x, raw):
    """Pure-JAX eval-mode reference matching the PyTorch module."""
    B, T, _ = x.shape
    H = HIDDEN

    def cell(x_t, h, c, w_ih, w_hh, b_ih, b_hh):
        gates = x_t @ w_ih.T + b_ih + h @ w_hh.T + b_hh
        i, f, g, o = jnp.split(gates, 4, axis=1)
        i = jax.nn.sigmoid(i)
        f = jax.nn.sigmoid(f)
        g = jnp.tanh(g)
        o = jax.nn.sigmoid(o)
        c = f * c + i * g
        h = o * jnp.tanh(c)
        return h, c

    h0 = c0 = h1 = c1 = jnp.zeros((B, H), jnp.float32)
    for t in range(T):
        h0, c0 = cell(x[:, t, :], h0, c0,
                      raw["w_ih0"], raw["w_hh0"], raw["b_ih0"], raw["b_hh0"])
        h1, c1 = cell(h0, h1, c1,
                      raw["w_ih1"], raw["w_hh1"], raw["b_ih1"], raw["b_hh1"])
    feat = jnp.maximum(h1, 0.0)
    return feat @ raw["w_lin"].T + raw["b_lin"]


if __name__ == "__main__":
    key = jax.random.PRNGKey(0)
    k_x, k_p = jax.random.split(key)

    B, T = 2, 8
    x = jax.random.normal(k_x, (B, T, INPUT), dtype=jnp.float32)
    param_slab, raw = init_params(k_p)

    out = my_model_forward(x, param_slab)
    jax.block_until_ready(out)
    assert out.shape == (B, 1), out.shape

    ref = _reference_forward(x, raw)
    assert jnp.allclose(out, ref, atol=1e-4, rtol=1e-3), (out, ref)

    print("KERNEL_OK")
</pallas_src>

<mosaic_0001>
module attributes {stable_mosaic.version = 11 : i64} {
  func.func @kernel(%arg0: memref<16x6xf32, #tpu.memory_space<vmem>>, %arg1: memref<24x64xf32, #tpu.memory_space<vmem>>, %arg2: memref<2x1xf32, #tpu.memory_space<vmem>>) attributes {dimension_semantics = [], scalar_prefetch = 0 : i64, scratch_operands = 0 : i64, tpu.core_type = #tpu.core_type<tc>} {
    %c0 = arith.constant 0 : index
    %c0_0 = arith.constant 0 : index
    %0 = vector.load %arg1[%c0, %c0_0] : memref<24x64xf32, #tpu.memory_space<vmem>>, vector<24x64xf32>
    %1 = vector.extract_strided_slice %0 {offsets = [0, 0], sizes = [6, 64], strides = [1, 1]} : vector<24x64xf32> to vector<6x64xf32>
    %2 = vector.extract_strided_slice %0 {offsets = [6, 0], sizes = [1, 64], strides = [1, 1]} : vector<24x64xf32> to vector<1x64xf32>
    %3 = vector.extract_strided_slice %0 {offsets = [7, 0], sizes = [1, 64], strides = [1, 1]} : vector<24x64xf32> to vector<1x64xf32>
    %4 = vector.extract_strided_slice %3 {offsets = [0, 0], sizes = [1, 8], strides = [1, 1]} : vector<1x64xf32> to vector<1x8xf32>
    %5 = vector.extract_strided_slice %3 {offsets = [0, 8], sizes = [1, 1], strides = [1, 1]} : vector<1x64xf32> to vector<1x1xf32>
    %6 = vector.extract_strided_slice %0 {offsets = [8, 0], sizes = [16, 64], strides = [1, 1]} : vector<24x64xf32> to vector<16x64xf32>
    %c0_1 = arith.constant 0 : index
    %c0_2 = arith.constant 0 : index
    %7 = vector.load %arg0[%c0_1, %c0_2] : memref<16x6xf32, #tpu.memory_space<vmem>>, vector<16x6xf32>
    %cst = arith.constant dense<0.000000e+00> : vector<16x64xf32>
    %8 = tpu.matmul %7, %1, %cst {dimension_numbers = #tpu.dot_dimension_numbers<[1], [0], [0], [1], [0, 0, 1, 1], [], []>} : vector<16x6xf32>, vector<6x64xf32>, vector<16x64xf32> -> vector<16x64xf32>
    %9 = vector.broadcast %2 : vector<1x64xf32> to vector<16x64xf32>
    %10 = arith.addf %8, %9 : vector<16x64xf32>
    %11 = tpu.iota {dimensions = array<i32: 1>} : vector<2x16xi32>
    %c8_i32 = arith.constant 8 : i32
    %12 = vector.broadcast %c8_i32 : i32 to vector<2x16xi32>
    %13 = arith.cmpi slt, %11, %12 : vector<2x16xi32>
    %14 = vector.extract_strided_slice %10 {offsets = [0, 0], sizes = [2, 64], strides = [1, 1]} : vector<16x64xf32> to vector<2x64xf32>
    %15 = arith.negf %14 : vector<2x64xf32>
    %16 = math.exp %15 : vector<2x64xf32>
    %cst_3 = arith.constant 1.000000e+00 : f32
    %17 = vector.broadcast %cst_3 : f32 to vector<2x64xf32>
    %18 = arith.addf %17, %16 : vector<2x64xf32>
    %19 = arith.divf %17, %18 : vector<2x64xf32>
    %20 = math.tanh %14 : vector<2x64xf32>
    %21 = vector.extract_strided_slice %19 {offsets = [0, 0], sizes = [2, 16], strides = [1, 1]} : vector<2x64xf32> to vector<2x16xf32>
    %22 = vector.extract_strided_slice %20 {offsets = [0, 32], sizes = [2, 16], strides = [1, 1]} : vector<2x64xf32> to vector<2x16xf32>
    %23 = vector.extract_strided_slice %19 {offsets = [0, 48], sizes = [2, 16], strides = [1, 1]} : vector<2x64xf32> to vector<2x16xf32>
    %24 = arith.mulf %21, %22 : vector<2x16xf32>
    %cst_4 = arith.constant 0.000000e+00 : f32
    %25 = vector.broadcast %cst_4 : f32 to vector<2x16xf32>
    %26 = arith.select %13, %24, %25 : vector<2x16xi1>, vector<2x16xf32>
    %27 = math.tanh %26 : vector<2x16xf32>
    %28 = arith.mulf %23, %27 : vector<2x16xf32>
    %29 = vector.extract_strided_slice %10 {offsets = [2, 0], sizes = [2, 64], strides = [1, 1]} : vector<16x64xf32> to vector<2x64xf32>
    %cst_5 = arith.constant dense<0.000000e+00> : vector<2x64xf32>
    %30 = tpu.matmul %28, %6, %cst_5 {dimension_numbers = #tpu.dot_dimension_numbers<[1], [0], [0], [1], [0, 0, 1, 1], [], []>} : vector<2x16xf32>, vector<16x64xf32>, vector<2x64xf32> -> vector<2x64xf32>
    %31 = arith.addf %30, %29 : vector<2x64xf32>
    %32 = arith.negf %31 : vector<2x64xf32>
    %33 = math.exp %32 : vector<2x64xf32>
    %cst_6 = arith.constant 1.000000e+00 : f32
    %34 = vector.broadcast %cst_6 : f32 to vector<2x64xf32>
    %35 = arith.addf %34, %33 : vector<2x64xf32>
    %36 = arith.divf %34, %35 : vector<2x64xf32>
    %37 = math.tanh %31 : vector<2x64xf32>
    %38 = vector.extract_strided_slice %36 {offsets = [0, 0], sizes = [2, 16], strides = [1, 1]} : vector<2x64xf32> to vector<2x16xf32>
    %39 = vector.extract_strided_slice %36 {offsets = [0, 16], sizes = [2, 16], strides = [1, 1]} : vector<2x64xf32> to vector<2x16xf32>
    %40 = vector.extract_strided_slice %37 {offsets = [0, 32], sizes = [2, 16], strides = [1, 1]} : vector<2x64xf32> to vector<2x16xf32>
    %41 = vector.extract_strided_slice %36 {offsets = [0, 48], sizes = [2, 16], strides = [1, 1]} : vector<2x64xf32> to vector<2x16xf32>
    %42 = arith.mulf %39, %26 : vector<2x16xf32>
    %43 = arith.mulf %38, %40 : vector<2x16xf32>
    %44 = arith.addf %42, %43 : vector<2x16xf32>
    %45 = math.tanh %44 : vector<2x16xf32>
    %46 = arith.mulf %41, %45 : vector<2x16xf32>
    %47 = vector.extract_strided_slice %10 {offsets = [4, 0], sizes = [2, 64], strides = [1, 1]} : vector<16x64xf32> to vector<2x64xf32>
    %cst_7 = arith.constant dense<0.000000e+00> : vector<2x64xf32>
    %48 = tpu.matmul %46, %6, %cst_7 {dimension_numbers = #tpu.dot_dimension_numbers<[1], [0], [0], [1], [0, 0, 1, 1], [], []>} : vector<2x16xf32>, vector<16x64xf32>, vector<2x64xf32> -> vector<2x64xf32>
    %49 = arith.addf %48, %47 : vector<2x64xf32>
    %50 = arith.negf %49 : vector<2x64xf32>
    %51 = math.exp %50 : vector<2x64xf32>
    %cst_8 = arith.constant 1.000000e+00 : f32
    %52 = vector.broadcast %cst_8 : f32 to vector<2x64xf32>
    %53 = arith.addf %52, %51 : vector<2x64xf32>
    %54 = arith.divf %52, %53 : vector<2x64xf32>
    %55 = math.tanh %49 : vector<2x64xf32>
    %56 = vector.extract_strided_slice %54 {offsets = [0, 0], sizes = [2, 16], strides = [1, 1]} : vector<2x64xf32> to vector<2x16xf32>
    %57 = vector.extract_strided_slice %54 {offsets = [0, 16], sizes = [2, 16], strides = [1, 1]} : vector<2x64xf32> to vector<2x16xf32>
    %58 = vector.extract_strided_slice %55 {offsets = [0, 32], sizes = [2, 16], strides = [1, 1]} : vector<2x64xf32> to vector<2x16xf32>
    %59 = vector.extract_strided_slice %54 {offsets = [0, 48], sizes = [2, 16], strides = [1, 1]} : vector<2x64xf32> to vector<2x16xf32>
    %60 = arith.mulf %57, %44 : vector<2x16xf32>
    %61 = arith.mulf %56, %58 : vector<2x16xf32>
    %62 = arith.addf %60, %61 : vector<2x16xf32>
    %63 = math.tanh %62 : vector<2x16xf32>
    %64 = arith.mulf %59, %63 : vector<2x16xf32>
    %65 = vector.extract_strided_slice %10 {offsets = [6, 0], sizes = [2, 64], strides = [1, 1]} : vector<16x64xf32> to vector<2x64xf32>
    %cst_9 = arith.constant dense<0.000000e+00> : vector<2x64xf32>
    %66 = tpu.matmul %64, %6, %cst_9 {dimension_numbers = #tpu.dot_dimension_numbers<[1], [0], [0], [1], [0, 0, 1, 1], [], []>} : vector<2x16xf32>, vector<16x64xf32>, vector<2x64xf32> -> vector<2x64xf32>
    %67 = arith.addf %66, %65 : vector<2x64xf32>
    %68 = arith.negf %67 : vector<2x64xf32>
    %69 = math.exp %68 : vector<2x64xf32>
    %cst_10 = arith.constant 1.000000e+00 : f32
    %70 = vector.broadcast %cst_10 : f32 to vector<2x64xf32>
    %71 = arith.addf %70, %69 : vector<2x64xf32>
    %72 = arith.divf %70, %71 : vector<2x64xf32>
    %73 = math.tanh %67 : vector<2x64xf32>
    %74 = vector.extract_strided_slice %72 {offsets = [0, 0], sizes = [2, 16], strides = [1, 1]} : vector<2x64xf32> to vector<2x16xf32>
    %75 = vector.extract_strided_slice %72 {offsets = [0, 16], sizes = [2, 16], strides = [1, 1]} : vector<2x64xf32> to vector<2x16xf32>
    %76 = vector.extract_strided_slice %73 {offsets = [0, 32], sizes = [2, 16], strides = [1, 1]} : vector<2x64xf32> to vector<2x16xf32>
    %77 = vector.extract_strided_slice %72 {offsets = [0, 48], sizes = [2, 16], strides = [1, 1]} : vector<2x64xf32> to vector<2x16xf32>
    %78 = arith.mulf %75, %62 : vector<2x16xf32>
    %79 = arith.mulf %74, %76 : vector<2x16xf32>
    %80 = arith.addf %78, %79 : vector<2x16xf32>
    %81 = math.tanh %80 : vector<2x16xf32>
    %82 = arith.mulf %77, %81 : vector<2x16xf32>
    %83 = vector.extract_strided_slice %10 {offsets = [8, 0], sizes = [2, 64], strides = [1, 1]} : vector<16x64xf32> to vector<2x64xf32>
    %cst_11 = arith.constant dense<0.000000e+00> : vector<2x64xf32>
    %84 = tpu.matmul %82, %6, %cst_11 {dimension_numbers = #tpu.dot_dimension_numbers<[1], [0], [0], [1], [0, 0, 1, 1], [], []>} : vector<2x16xf32>, vector<16x64xf32>, vector<2x64xf32> -> vector<2x64xf32>
    %85 = arith.addf %84, %83 : vector<2x64xf32>
    %86 = arith.negf %85 : vector<2x64xf32>
    %87 = math.exp %86 : vector<2x64xf32>
    %cst_12 = arith.constant 1.000000e+00 : f32
    %88 = vector.broadcast %cst_12 : f32 to vector<2x64xf32>
    %89 = arith.addf %88, %87 : vector<2x64xf32>
    %90 = arith.divf %88, %89 : vector<2x64xf32>
    %91 = math.tanh %85 : vector<2x64xf32>
    %92 = vector.extract_strided_slice %90 {offsets = [0, 0], sizes = [2, 16], strides = [1, 1]} : vector<2x64xf32> to vector<2x16xf32>
    %93 = vector.extract_strided_slice %90 {offsets = [0, 16], sizes = [2, 16], strides = [1, 1]} : vector<2x64xf32> to vector<2x16xf32>
    %94 = vector.extract_strided_slice %91 {offsets = [0, 32], sizes = [2, 16], strides = [1, 1]} : vector<2x64xf32> to vector<2x16xf32>
    %95 = vector.extract_strided_slice %90 {offsets = [0, 48], sizes = [2, 16], strides = [1, 1]} : vector<2x64xf32> to vector<2x16xf32>
    %96 = arith.mulf %93, %80 : vector<2x16xf32>
    %97 = arith.mulf %92, %94 : vector<2x16xf32>
    %98 = arith.addf %96, %97 : vector<2x16xf32>
    %99 = math.tanh %98 : vector<2x16xf32>
    %100 = arith.mulf %95, %99 : vector<2x16xf32>
    %101 = vector.extract_strided_slice %10 {offsets = [10, 0], sizes = [2, 64], strides = [1, 1]} : vector<16x64xf32> to vector<2x64xf32>
    %cst_13 = arith.constant dense<0.000000e+00> : vector<2x64xf32>
    %102 = tpu.matmul %100, %6, %cst_13 {dimension_numbers = #tpu.dot_dimension_numbers<[1], [0], [0], [1], [0, 0, 1, 1], [], []>} : vector<2x16xf32>, vector<16x64xf32>, vector<2x64xf32> -> vector<2x64xf32>
    %103 = arith.addf %102, %101 : vector<2x64xf32>
    %104 = arith.negf %103 : vector<2x64xf32>
    %105 = math.exp %104 : vector<2x64xf32>
    %cst_14 = arith.constant 1.000000e+00 : f32
    %106 = vector.broadcast %cst_14 : f32 to vector<2x64xf32>
    %107 = arith.addf %106, %105 : vector<2x64xf32>
    %108 = arith.divf %106, %107 : vector<2x64xf32>
    %109 = math.tanh %103 : vector<2x64xf32>
    %110 = vector.extract_strided_slice %108 {offsets = [0, 0], sizes = [2, 16], strides = [1, 1]} : vector<2x64xf32> to vector<2x16xf32>
    %111 = vector.extract_strided_slice %108 {offsets = [0, 16], sizes = [2, 16], strides = [1, 1]} : vector<2x64xf32> to vector<2x16xf32>
    %112 = vector.extract_strided_slice %109 {offsets = [0, 32], sizes = [2, 16], strides = [1, 1]} : vector<2x64xf32> to vector<2x16xf32>
    %113 = vector.extract_strided_slice %108 {offsets = [0, 48], sizes = [2, 16], strides = [1, 1]} : vector<2x64xf32> to vector<2x16xf32>
    %114 = arith.mulf %111, %98 : vector<2x16xf32>
    %115 = arith.mulf %110, %112 : vector<2x16xf32>
    %116 = arith.addf %114, %115 : vector<2x16xf32>
    %117 = math.tanh %116 : vector<2x16xf32>
    %118 = arith.mulf %113, %117 : vector<2x16xf32>
    %119 = vector.extract_strided_slice %10 {offsets = [12, 0], sizes = [2, 64], strides = [1, 1]} : vector<16x64xf32> to vector<2x64xf32>
    %cst_15 = arith.constant dense<0.000000e+00> : vector<2x64xf32>
    %120 = tpu.matmul %118, %6, %cst_15 {dimension_numbers = #tpu.dot_dimension_numbers<[1], [0], [0], [1], [0, 0, 1, 1], [], []>} : vector<2x16xf32>, vector<16x64xf32>, vector<2x64xf32> -> vector<2x64xf32>
    %121 = arith.addf %120, %119 : vector<2x64xf32>
    %122 = arith.negf %121 : vector<2x64xf32>
    %123 = math.exp %122 : vector<2x64xf32>
    %cst_16 = arith.constant 1.000000e+00 : f32
    %124 = vector.broadcast %cst_16 : f32 to vector<2x64xf32>
    %125 = arith.addf %124, %123 : vector<2x64xf32>
    %126 = arith.divf %124, %125 : vector<2x64xf32>
    %127 = math.tanh %121 : vector<2x64xf32>
    %128 = vector.extract_strided_slice %126 {offsets = [0, 0], sizes = [2, 16], strides = [1, 1]} : vector<2x64xf32> to vector<2x16xf32>
    %129 = vector.extract_strided_slice %126 {offsets = [0, 16], sizes = [2, 16], strides = [1, 1]} : vector<2x64xf32> to vector<2x16xf32>
    %130 = vector.extract_strided_slice %127 {offsets = [0, 32], sizes = [2, 16], strides = [1, 1]} : vector<2x64xf32> to vector<2x16xf32>
    %131 = vector.extract_strided_slice %126 {offsets = [0, 48], sizes = [2, 16], strides = [1, 1]} : vector<2x64xf32> to vector<2x16xf32>
    %132 = arith.mulf %129, %116 : vector<2x16xf32>
    %133 = arith.mulf %128, %130 : vector<2x16xf32>
    %134 = arith.addf %132, %133 : vector<2x16xf32>
    %135 = math.tanh %134 : vector<2x16xf32>
    %136 = arith.mulf %131, %135 : vector<2x16xf32>
    %137 = vector.extract_strided_slice %10 {offsets = [14, 0], sizes = [2, 64], strides = [1, 1]} : vector<16x64xf32> to vector<2x64xf32>
    %cst_17 = arith.constant dense<0.000000e+00> : vector<2x64xf32>
    %138 = tpu.matmul %136, %6, %cst_17 {dimension_numbers = #tpu.dot_dimension_numbers<[1], [0], [0], [1], [0, 0, 1, 1], [], []>} : vector<2x16xf32>, vector<16x64xf32>, vector<2x64xf32> -> vector<2x64xf32>
    %139 = arith.addf %138, %137 : vector<2x64xf32>
    %140 = arith.negf %139 : vector<2x64xf32>
    %141 = math.exp %140 : vector<2x64xf32>
    %cst_18 = arith.constant 1.000000e+00 : f32
    %142 = vector.broadcast %cst_18 : f32 to vector<2x64xf32>
    %143 = arith.addf %142, %141 : vector<2x64xf32>
    %144 = arith.divf %142, %143 : vector<2x64xf32>
    %145 = math.tanh %139 : vector<2x64xf32>
    %146 = vector.extract_strided_slice %144 {offsets = [0, 0], sizes = [2, 16], strides = [1, 1]} : vector<2x64xf32> to vector<2x16xf32>
    %147 = vector.extract_strided_slice %144 {offsets = [0, 16], sizes = [2, 16], strides = [1, 1]} : vector<2x64xf32> to vector<2x16xf32>
    %148 = vector.extract_strided_slice %145 {offsets = [0, 32], sizes = [2, 16], strides = [1, 1]} : vector<2x64xf32> to vector<2x16xf32>
    %149 = vector.extract_strided_slice %144 {offsets = [0, 48], sizes = [2, 16], strides = [1, 1]} : vector<2x64xf32> to vector<2x16xf32>
    %150 = arith.mulf %147, %134 : vector<2x16xf32>
    %151 = arith.mulf %146, %148 : vector<2x16xf32>
    %152 = arith.addf %150, %151 : vector<2x16xf32>
    %153 = math.tanh %152 : vector<2x16xf32>
    %154 = arith.mulf %149, %153 : vector<2x16xf32>
    %cst_19 = arith.constant dense<0.000000e+00> : vector<2x64xf32>
    %155 = tpu.matmul %154, %6, %cst_19 {dimension_numbers = #tpu.dot_dimension_numbers<[1], [0], [0], [1], [0, 0, 1, 1], [], []>} : vector<2x16xf32>, vector<16x64xf32>, vector<2x64xf32> -> vector<2x64xf32>
    %156 = vector.broadcast %2 : vector<1x64xf32> to vector<2x64xf32>
    %157 = arith.addf %155, %156 : vector<2x64xf32>
    %158 = arith.negf %157 : vector<2x64xf32>
    %159 = math.exp %158 : vector<2x64xf32>
    %cst_20 = arith.constant 1.000000e+00 : f32
    %160 = vector.broadcast %cst_20 : f32 to vector<2x64xf32>
    %161 = arith.addf %160, %159 : vector<2x64xf32>
    %162 = arith.divf %160, %161 : vector<2x64xf32>
    %163 = math.tanh %157 : vector<2x64xf32>
    %164 = vector.extract_strided_slice %162 {offsets = [0, 0], sizes = [2, 16], strides = [1, 1]} : vector<2x64xf32> to vector<2x16xf32>
    %165 = vector.extract_strided_slice %162 {offsets = [0, 16], sizes = [2, 16], strides = [1, 1]} : vector<2x64xf32> to vector<2x16xf32>
    %166 = vector.extract_strided_slice %163 {offsets = [0, 32], sizes = [2, 16], strides = [1, 1]} : vector<2x64xf32> to vector<2x16xf32>
    %167 = vector.extract_strided_slice %162 {offsets = [0, 48], sizes = [2, 16], strides = [1, 1]} : vector<2x64xf32> to vector<2x16xf32>
    %168 = arith.mulf %165, %152 : vector<2x16xf32>
    %169 = arith.mulf %164, %166 : vector<2x16xf32>
    %170 = arith.addf %168, %169 : vector<2x16xf32>
    %171 = math.tanh %170 : vector<2x16xf32>
    %172 = arith.mulf %167, %171 : vector<2x16xf32>
    %173 = vector.extract_strided_slice %172 {offsets = [0, 8], sizes = [2, 8], strides = [1, 1]} : vector<2x16xf32> to vector<2x8xf32>
    %cst_21 = arith.constant 0.000000e+00 : f32
    %174 = vector.broadcast %cst_21 : f32 to vector<2x8xf32>
    %175 = arith.maximumf %173, %174 : vector<2x8xf32>
    %176 = vector.broadcast %4 : vector<1x8xf32> to vector<2x8xf32>
    %177 = arith.mulf %175, %176 : vector<2x8xf32>
    %cst_22 = arith.constant dense<0.000000e+00> : vector<2xf32>
    %178 = vector.multi_reduction <add>, %177, %cst_22 [1] : vector<2x8xf32> to vector<2xf32>
    %179 = vector.shape_cast %178 : vector<2xf32> to vector<2x1xf32>
    %180 = vector.broadcast %5 : vector<1x1xf32> to vector<2x1xf32>
    %181 = arith.addf %179, %180 : vector<2x1xf32>
    %c0_23 = arith.constant 0 : index
    %c0_24 = arith.constant 0 : index
    %182 = vector.load %arg2[%c0_23, %c0_24] : memref<2x1xf32, #tpu.memory_space<vmem>>, vector<2x1xf32>
    tpu.vector_store %arg2[%c0_23, %c0_24], %181 {strides = array<i32>} : memref<2x1xf32, #tpu.memory_space<vmem>>, vector<2x1xf32>,
    return
  }
}

</mosaic_0001>

<bundles_post_ra>
// kernel: my_model_forward.1
= control target key start
LH: loop header
LB: loop body
LE: loop exit
PB: predicated region body
PF: predicated region fallthrough
CT: control target
= control target key end

     0   :  { %vm27_vm0 = vcmask 1045504   ;;  %vm20_vm1 = vcmask 48128   ;;  %v16_v3 = vlaneseq  ;;  %v1184_v22 = vmov 0.0|0.0   ;;  %s1188_s19 = smov 16   ;;  %s1189_s20 = smov 80   ;;  %s1334_s1 = inlined_call_operand.vmem [shape: f32[24,64], index: 1, kind: input, shape index: {}]   ;;  %s1335_s0 = inlined_call_operand.vmem [shape: f32[16,6], index: 0, kind: input, shape index: {}]   ;;  %s1336_s2 = inlined_call_operand.vmem [shape: f32[2,1], index: 2, kind: output, shape index: {}]  }
   0x1   :  { %v1212_v0 = vld [vmem:[%s1334_s1] sm:$0xff]  ;;  %v15_v2 = vld [vmem:[%s1335_s0 + $0x8] sm:$0xff]  ;;  %v13_v17 = vld [vmem:[%s1334_s1 + $0x10] sm:$0xff]  ;;  %1076 = vmatprep.subr.bf16.mxu1 %v1184_v22  ;;  %vm1185_vm3 = vmmov 0   ;;  %v1186_v23 = vmov 0.0   ;;  %vm134_vm4 = vcmask 130048  }
   0x2   :  { %1015 = vmatprep.subr.msk.mxu0 %vm27_vm0, %v1212_v0  ;;  %v14_v1 = vld [vmem:[%s1335_s0] sm:$0xff]  ;;  %v1222_v4 = vshrl.u32 %v16_v3, 7  ;;  %s1183_s0 = smov 96   ;;  %v107_v14 = vand.u32 127, %v16_v3  ;;  %v12_v16 = vld [vmem:[%s1334_s1 + $0x8] sm:$0xff]  ;;  %1024 = vmatprep.mubr.msk.f32.mxu1 %vm1185_vm3, %v1186_v23  ;;  %s1187_s1 = smov 48  }
   0x3   :  { %1016 = vmatpush3.msk.msra.mxu0 %vm27_vm0, %v1212_v0  ;;  %1017 = vmatprep.mubr.msk.f32.mxu0 %vm20_vm1, %v14_v1  ;;  %v1242_v20 = vpack.c.bf16 %v13_v17, %v12_v16  ;;  %s1190_s21 = smov 32   ;;  %s1191_s22 = smov 56   ;;  %vm953_vm5 = vcmask 58368   ;;  %vm962_vm6 = vcmask 1024  }
   0x4   :  { %1018 = vmatmul.mubr.msk.f32.vlgmr.msra.gmra.mrb[0].mxu0 %vm20_vm1, %v15_v2  ;;  %v18_v5 = vsub.s32 6, %v1222_v4  ;;  %vm108_vm2 = vcmp.lt.s32.totalorder %v107_v14, 8  ;;  %1079 = vmatprep.subr.bf16.mxu0 %v1184_v22  ;;  %s1192_s23 = smov 72   ;;  %s1193_s24 = smov 120  }
   0x5   :  { %1078 = vmatpush3.bf16.msra.mxu1 %v1242_v20  ;;  %1081 = vmatpush3.bf16.msra.mxu0 %v1242_v20 }
   0x6   :  { %v1226_v6 = vrot.slane %v1212_v0, %v18_v5  ;;  %1031 = vmatprep.mubr.msk.f32.mxu0 %vm1185_vm3, %v1186_v23  ;;  %1082 = vmatprep.subr.bf16.mxu1 %v1184_v22 }
   0x7   :  { %1085 = vmatprep.subr.bf16.mxu0 %v1184_v22 }
  0xd7   :  { %v1228_v7 = vpop.f32.mrb[0].mxu0 }
  0xd8   :  { %v97_v8 = vpop.f32.mrb[1].mxu0 }
  0xd9   :  { %v1231_v9 = vadd.f32 %v97_v8, %v1226_v6 }
  0xdb   :  { %1111 = vtanh.f32 %v1231_v9  ;;  %v971_v11 = vmul.f32 -1.442695, %v1231_v9  ;;  %v132_v28 = vrot.slane %v1231_v9, 2  ;;  %v238_v47 = vrot.slane %v1231_v9, 4 }
  0xdc   :  { %v339_v2 = vrot.slane %v1231_v9, 6 }
  0xdd   :  { %1113 = vpow2.f32 %v971_v11 }
  0xe5   :  { %v1112_v10 = vpop.eup %1111 }
  0xe6   :  { %117 = vrot.lane.b32.xlu0 %v1112_v10, %s1183_s0 }
  0xe7   :  { %v1114_v12 = vpop.eup %1113 }
  0xe8   :  { %v112_v13 = vadd.f32 1.0, %v1114_v12 }
  0xea   :  { %1115 = vrcp.f32 %v112_v13 }
  0xf4   :  { %v1116_v15 = vpop.eup %1115 }
 0x158   :  { %v118_v18 = vpop.permute.xlu0 %117 }
 0x159   :  { %v120_v19 = vmul.f32 %v1116_v15, %v118_v18 }
 0x15b   :  { %v121_v21 = vsel %vm108_vm2, %v120_v19, 0.0 }
 0x15c   :  { %1117 = vtanh.f32 %v121_v21 }
 0x166   :  { %v1118_v24 = vpop.eup %1117 }
 0x167   :  { %124 = vrot.lane.b32.xlu0 %v1118_v24, %s1187_s1 }
 0x16b   :  { %215 = vrot.lane.b32.xlu0 %v121_v21, %s1188_s19 }
 0x1d9   :  { %v125_v25 = vpop.permute.xlu0 %124 }
 0x1da   :  { %v127_v26 = vmul.f32 %v1116_v15, %v125_v25 }
 0x1dc   :  { %129 = vrot.lane.b32.xlu1 %v127_v26, %s1189_s20  ;;  %v1293_v26 = vadd.f32 %v1228_v7, %v1226_v6 }
 0x1dd   :  { %v216_v39 = vpop.permute.xlu0 %215 }
 0x24e   :  { %v130_v27 = vpop.permute.xlu1 %129 }
 0x24f   :  { %1025 = vmatmul.mubr.msk.f32.vlgmr.msra.gmra.mrb[0].mxu1 %vm134_vm4, %v130_v27 }
 0x250   :  { %1084 = vmatpush3.bf16.msra.mxu1 %v1242_v20  ;;  %1038 = vmatprep.mubr.msk.f32.mxu1 %vm1185_vm3, %v1186_v23 }
 0x251   :  { %1088 = vmatprep.subr.bf16.mxu1 %v1184_v22 }
 0x322   :  { %v203_v29 = vpop.f32.mrb[0].mxu1 }
 0x323   :  { %v204_v30 = vadd.f32 %v203_v29, %v132_v28  ;;  %v1026_v31 = vpop.f32.mrb[1].mxu1 }
 0x325   :  { %1119 = vtanh.f32 %v204_v30  ;;  %v973_v33 = vmul.f32 -1.442695, %v204_v30 }
 0x327   :  { %1121 = vpow2.f32 %v973_v33 }
 0x32f   :  { %v1120_v32 = vpop.eup %1119 }
 0x330   :  { %220 = vrot.lane.b32.xlu1 %v1120_v32, %s1183_s0 }
 0x331   :  { %v1122_v34 = vpop.eup %1121 }
 0x332   :  { %v210_v35 = vadd.f32 1.0, %v1122_v34 }
 0x334   :  { %1123 = vrcp.f32 %v210_v35 }
 0x33e   :  { %v1124_v36 = vpop.eup %1123 }
 0x33f   :  { %v218_v40 = vmul.f32 %v1124_v36, %v216_v39 }
 0x3a2   :  { %v221_v37 = vpop.permute.xlu1 %220 }
 0x3a3   :  { %v223_v38 = vmul.f32 %v1124_v36, %v221_v37 }
 0x3a5   :  { %225 = vrot.lane.b32.xlu1 %v223_v38, %s1188_s19 }
 0x417   :  { %v226_v41 = vpop.permute.xlu1 %225 }
 0x418   :  { %v228_v42 = vadd.f32 %v226_v41, %v218_v40 }
 0x41a   :  { %1125 = vtanh.f32 %v228_v42 }
 0x424   :  { %v1126_v43 = vpop.eup %1125 }
 0x425   :  { %231 = vrot.lane.b32.xlu0 %v1126_v43, %s1190_s21 }
 0x497   :  { %v232_v44 = vpop.permute.xlu0 %231 }
 0x498   :  { %v234_v45 = vmul.f32 %v1124_v36, %v232_v44 }
 0x49a   :  { %236 = vrot.lane.b32.xlu1 %v234_v45, %s1189_s20 }
 0x50c   :  { %v237_v46 = vpop.permute.xlu1 %236 }
 0x50d   :  { %1032 = vmatmul.mubr.msk.f32.vlgmr.msra.gmra.mrb[2].mxu0 %vm134_vm4, %v237_v46 }
 0x50e   :  { %1087 = vmatpush3.bf16.msra.mxu0 %v1242_v20  ;;  %1045 = vmatprep.mubr.msk.f32.mxu0 %vm1185_vm3, %v1186_v23 }
 0x50f   :  { %1091 = vmatprep.subr.bf16.mxu0 %v1184_v22 }
 0x5e0   :  { %v308_v48 = vpop.f32.mrb[2].mxu0 }
 0x5e1   :  { %v309_v49 = vadd.f32 %v308_v48, %v238_v47  ;;  %v1033_v50 = vpop.f32.mrb[3].mxu0 }
 0x5e3   :  { %1127 = vtanh.f32 %v309_v49  ;;  %v975_v52 = vmul.f32 -1.442695, %v309_v49 }
 0x5e5   :  { %1129 = vpow2.f32 %v975_v52 }
 0x5ed   :  { %v1128_v51 = vpop.eup %1127 }
 0x5ee   :  { %321 = vrot.lane.b32.xlu0 %v1128_v51, %s1183_s0 }
 0x5ef   :  { %v1130_v53 = vpop.eup %1129 }
 0x5f0   :  { %v315_v54 = vadd.f32 1.0, %v1130_v53 }
 0x5f2   :  { %1131 = vrcp.f32 %v315_v54 }
 0x5fc   :  { %v1132_v55 = vpop.eup %1131 }
 0x5fd   :  { %v319_v58 = vmul.f32 %v1132_v55, %v228_v42  ;;  %v540_v42 = vrot.slane %v1293_v26, 2 }
 0x660   :  { %v322_v56 = vpop.permute.xlu0 %321 }
 0x661   :  { %v324_v57 = vmul.f32 %v1132_v55, %v322_v56 }
 0x663   :  { %326 = vrot.lane.b32.xlu1 %v324_v57, %s1188_s19 }
 0x6d5   :  { %v327_v59 = vpop.permute.xlu1 %326 }
 0x6d6   :  { %v329_v60 = vadd.f32 %v327_v59, %v319_v58 }
 0x6d8   :  { %1133 = vtanh.f32 %v329_v60 }
 0x6e2   :  { %v1134_v61 = vpop.eup %1133 }
 0x6e3   :  { %332 = vrot.lane.b32.xlu0 %v1134_v61, %s1190_s21 }
 0x755   :  { %v333_v62 = vpop.permute.xlu0 %332 }
 0x756   :  { %v335_v63 = vmul.f32 %v1132_v55, %v333_v62 }
 0x758   :  { %337 = vrot.lane.b32.xlu1 %v335_v63, %s1189_s20 }
 0x7ca   :  { %v338_v1 = vpop.permute.xlu1 %337 }
 0x7cb   :  { %1039 = vmatmul.mubr.msk.f32.vlgmr.msra.gmra.mrb[2].mxu1 %vm134_vm4, %v338_v1 }
 0x7cc   :  { %1090 = vmatpush3.bf16.msra.mxu1 %v1242_v20  ;;  %1052 = vmatprep.mubr.msk.f32.mxu1 %vm1185_vm3, %v1186_v23 }
 0x7cd   :  { %1094 = vmatprep.subr.bf16.mxu1 %v1184_v22 }
 0x89e   :  { %v409_v3 = vpop.f32.mrb[2].mxu1 }
 0x89f   :  { %v410_v5 = vadd.f32 %v409_v3, %v339_v2  ;;  %v1040_v8 = vpop.f32.mrb[3].mxu1 }
 0x8a1   :  { %1135 = vtanh.f32 %v410_v5  ;;  %v977_v11 = vmul.f32 -1.442695, %v410_v5 }
 0x8a3   :  { %1137 = vpow2.f32 %v977_v11 }
 0x8ab   :  { %v1136_v10 = vpop.eup %1135 }
 0x8ac   :  { %422 = vrot.lane.b32.xlu0 %v1136_v10, %s1183_s0 }
 0x8ad   :  { %v1138_v12 = vpop.eup %1137 }
 0x8ae   :  { %v416_v13 = vadd.f32 1.0, %v1138_v12 }
 0x8b0   :  { %1139 = vrcp.f32 %v416_v13 }
 0x8ba   :  { %v1140_v14 = vpop.eup %1139 }
 0x8bb   :  { %v420_v17 = vmul.f32 %v1140_v14, %v329_v60  ;;  %v641_v60 = vrot.slane %v1293_v26, 4 }
 0x91e   :  { %v423_v15 = vpop.permute.xlu0 %422 }
 0x91f   :  { %v425_v16 = vmul.f32 %v1140_v14, %v423_v15 }
 0x921   :  { %427 = vrot.lane.b32.xlu1 %v425_v16, %s1188_s19 }
 0x993   :  { %v428_v18 = vpop.permute.xlu1 %427 }
 0x994   :  { %v430_v9 = vadd.f32 %v428_v18, %v420_v17  ;;  %v742_v17 = vrot.slane %v1293_v26, 6 }
 0x996   :  { %1141 = vtanh.f32 %v430_v9 }
 0x9a0   :  { %v1142_v19 = vpop.eup %1141 }
 0x9a1   :  { %433 = vrot.lane.b32.xlu0 %v1142_v19, %s1190_s21 }
 0xa13   :  { %v434_v21 = vpop.permute.xlu0 %433 }
 0xa14   :  { %v436_v24 = vmul.f32 %v1140_v14, %v434_v21 }
 0xa16   :  { %438 = vrot.lane.b32.xlu1 %v436_v24, %s1189_s20 }
 0xa88   :  { %v439_v25 = vpop.permute.xlu1 %438 }
 0xa89   :  { %1046 = vmatmul.mubr.msk.f32.vlgmr.msra.gmra.mrb[4].mxu0 %vm134_vm4, %v439_v25 }
 0xa8a   :  { %1093 = vmatpush3.bf16.msra.mxu0 %v1242_v20  ;;  %1059 = vmatprep.mubr.msk.f32.mxu0 %vm1185_vm3, %v1186_v23 }
 0xa8b   :  { %1097 = vmatprep.subr.bf16.mxu0 %v1184_v22 }
 0xb5c   :  { %v508_v27 = vpop.f32.mrb[4].mxu0 }
 0xb5d   :  { %v509_v28 = vadd.f32 %v508_v27, %v1293_v26  ;;  %v1047_v29 = vpop.f32.mrb[5].mxu0 }
 0xb5f   :  { %1143 = vtanh.f32 %v509_v28  ;;  %v979_v31 = vmul.f32 -1.442695, %v509_v28 }
 0xb61   :  { %1145 = vpow2.f32 %v979_v31 }
 0xb69   :  { %v1144_v30 = vpop.eup %1143 }
 0xb6a   :  { %521 = vrot.lane.b32.xlu0 %v1144_v30, %s1183_s0 }
 0xb6b   :  { %v1146_v32 = vpop.eup %1145 }
 0xb6c   :  { %v515_v33 = vadd.f32 1.0, %v1146_v32 }
 0xb6e   :  { %1147 = vrcp.f32 %v515_v33 }
 0xb78   :  { %v1148_v34 = vpop.eup %1147 }
 0xb79   :  { %v519_v7 = vmul.f32 %v1148_v34, %v430_v9 }
 0xbdc   :  { %v522_v35 = vpop.permute.xlu0 %521 }
 0xbdd   :  { %v524_v22 = vmul.f32 %v1148_v34, %v522_v35 }
 0xbdf   :  { %526 = vrot.lane.b32.xlu1 %v524_v22, %s1188_s19 }
 0xc51   :  { %v527_v36 = vpop.permute.xlu1 %526 }
 0xc52   :  { %v529_v37 = vadd.f32 %v527_v36, %v519_v7 }
 0xc54   :  { %1149 = vtanh.f32 %v529_v37 }
 0xc5e   :  { %v1150_v38 = vpop.eup %1149 }
 0xc5f   :  { %532 = vrot.lane.b32.xlu0 %v1150_v38, %s1190_s21 }
 0xcd1   :  { %v533_v39 = vpop.permute.xlu0 %532 }
 0xcd2   :  { %v535_v40 = vmul.f32 %v1148_v34, %v533_v39 }
 0xcd4   :  { %537 = vrot.lane.b32.xlu1 %v535_v40, %s1189_s20 }
 0xd46   :  { %v538_v41 = vpop.permute.xlu1 %537 }
 0xd47   :  { %1053 = vmatmul.mubr.msk.f32.vlgmr.msra.gmra.mrb[4].mxu1 %vm134_vm4, %v538_v41 }
 0xd48   :  { %1096 = vmatpush3.bf16.msra.mxu1 %v1242_v20  ;;  %1066 = vmatprep.mubr.msk.f32.mxu1 %vm1185_vm3, %v1186_v23 }
 0xe1a   :  { %v610_v43 = vpop.f32.mrb[4].mxu1 }
 0xe1b   :  { %v611_v44 = vadd.f32 %v610_v43, %v540_v42  ;;  %v1054_v45 = vpop.f32.mrb[5].mxu1 }
 0xe1c   :  { %v942_v45 = vsub.s32 7, %v1222_v4 }
 0xe1d   :  { %1151 = vtanh.f32 %v611_v44  ;;  %v981_v47 = vmul.f32 -1.442695, %v611_v44 }
 0xe1f   :  { %1153 = vpow2.f32 %v981_v47 }
 0xe27   :  { %v1152_v46 = vpop.eup %1151 }
 0xe28   :  { %623 = vrot.lane.b32.xlu0 %v1152_v46, %s1183_s0  ;;  %v943_v46 = vrot.slane %v1212_v0, %v942_v45 }
 0xe29   :  { %v1154_v48 = vpop.eup %1153 }
 0xe2a   :  { %v617_v49 = vadd.f32 1.0, %v1154_v48 }
 0xe2c   :  { %1155 = vrcp.f32 %v617_v49 }
 0xe36   :  { %v1156_v50 = vpop.eup %1155 }
 0xe37   :  { %v621_v53 = vmul.f32 %v1156_v50, %v529_v37 }
 0xe9a   :  { %v624_v51 = vpop.permute.xlu0 %623 }
 0xe9b   :  { %v626_v52 = vmul.f32 %v1156_v50, %v624_v51 }
 0xe9d   :  { %628 = vrot.lane.b32.xlu1 %v626_v52, %s1188_s19 }
 0xf0f   :  { %v629_v54 = vpop.permute.xlu1 %628 }
 0xf10   :  { %v631_v55 = vadd.f32 %v629_v54, %v621_v53 }
 0xf12   :  { %1157 = vtanh.f32 %v631_v55 }
 0xf1c   :  { %v1158_v56 = vpop.eup %1157 }
 0xf1d   :  { %634 = vrot.lane.b32.xlu0 %v1158_v56, %s1190_s21 }
 0xf8f   :  { %v635_v57 = vpop.permute.xlu0 %634 }
 0xf90   :  { %v637_v58 = vmul.f32 %v1156_v50, %v635_v57 }
 0xf92   :  { %639 = vrot.lane.b32.xlu1 %v637_v58, %s1189_s20 }
0x1004   :  { %v640_v59 = vpop.permute.xlu1 %639 }
0x1005   :  { %1060 = vmatmul.mubr.msk.f32.vlgmr.msra.gmra.mrb[6].mxu0 %vm134_vm4, %v640_v59 }
0x1006   :  { %1099 = vmatpush3.bf16.msra.mxu0 %v1242_v20  ;;  %1073 = vmatprep.mubr.msk.f32.mxu0 %vm1185_vm3, %v1186_v23 }
0x10d8   :  { %v711_v61 = vpop.f32.mrb[6].mxu0 }
0x10d9   :  { %v712_v62 = vadd.f32 %v711_v61, %v641_v60  ;;  %v1061_v63 = vpop.f32.mrb[7].mxu0 }
0x10db   :  { %1159 = vtanh.f32 %v712_v62  ;;  %v983_v2 = vmul.f32 -1.442695, %v712_v62 }
0x10dd   :  { %1161 = vpow2.f32 %v983_v2 }
0x10e5   :  { %v1160_v1 = vpop.eup %1159 }
0x10e6   :  { %724 = vrot.lane.b32.xlu0 %v1160_v1, %s1183_s0 }
0x10e7   :  { %v1162_v3 = vpop.eup %1161 }
0x10e8   :  { %v718_v5 = vadd.f32 1.0, %v1162_v3 }
0x10ea   :  { %1163 = vrcp.f32 %v718_v5 }
0x10f4   :  { %v1164_v8 = vpop.eup %1163 }
0x10f5   :  { %v722_v23 = vmul.f32 %v1164_v8, %v631_v55 }
0x1158   :  { %v725_v10 = vpop.permute.xlu0 %724 }
0x1159   :  { %v727_v20 = vmul.f32 %v1164_v8, %v725_v10 }
0x115b   :  { %729 = vrot.lane.b32.xlu1 %v727_v20, %s1188_s19 }
0x11cd   :  { %v730_v11 = vpop.permute.xlu1 %729 }
0x11ce   :  { %v732_v12 = vadd.f32 %v730_v11, %v722_v23 }
0x11d0   :  { %1165 = vtanh.f32 %v732_v12 }
0x11da   :  { %v1166_v13 = vpop.eup %1165 }
0x11db   :  { %735 = vrot.lane.b32.xlu0 %v1166_v13, %s1190_s21 }
0x124d   :  { %v736_v14 = vpop.permute.xlu0 %735 }
0x124e   :  { %v738_v15 = vmul.f32 %v1164_v8, %v736_v14 }
0x1250   :  { %740 = vrot.lane.b32.xlu1 %v738_v15, %s1189_s20 }
0x12c2   :  { %v741_v16 = vpop.permute.xlu1 %740 }
0x12c3   :  { %1067 = vmatmul.mubr.msk.f32.vlgmr.msra.gmra.mrb[6].mxu1 %vm134_vm4, %v741_v16 }
0x1396   :  { %v812_v18 = vpop.f32.mrb[6].mxu1 }
0x1397   :  { %v813_v9 = vadd.f32 %v812_v18, %v742_v17  ;;  %v1068_v19 = vpop.f32.mrb[7].mxu1 }
0x1399   :  { %1167 = vtanh.f32 %v813_v9  ;;  %v985_v24 = vmul.f32 -1.442695, %v813_v9 }
0x139b   :  { %1169 = vpow2.f32 %v985_v24 }
0x13a3   :  { %v1168_v21 = vpop.eup %1167 }
0x13a4   :  { %825 = vrot.lane.b32.xlu0 %v1168_v21, %s1183_s0 }
0x13a5   :  { %v1170_v25 = vpop.eup %1169 }
0x13a6   :  { %v819_v27 = vadd.f32 1.0, %v1170_v25 }
0x13a8   :  { %1171 = vrcp.f32 %v819_v27 }
0x13b2   :  { %v1172_v28 = vpop.eup %1171 }
0x13b3   :  { %v823_v31 = vmul.f32 %v1172_v28, %v732_v12 }
0x1416   :  { %v826_v29 = vpop.permute.xlu0 %825 }
0x1417   :  { %v828_v30 = vmul.f32 %v1172_v28, %v826_v29 }
0x1419   :  { %830 = vrot.lane.b32.xlu1 %v828_v30, %s1188_s19 }
0x148b   :  { %v831_v32 = vpop.permute.xlu1 %830 }
0x148c   :  { %v833_v26 = vadd.f32 %v831_v32, %v823_v31 }
0x148e   :  { %1173 = vtanh.f32 %v833_v26 }
0x1498   :  { %v1174_v33 = vpop.eup %1173 }
0x1499   :  { %836 = vrot.lane.b32.xlu0 %v1174_v33, %s1190_s21 }
0x150b   :  { %v837_v34 = vpop.permute.xlu0 %836 }
0x150c   :  { %v839_v35 = vmul.f32 %v1172_v28, %v837_v34 }
0x150e   :  { %841 = vrot.lane.b32.xlu1 %v839_v35, %s1189_s20 }
0x1580   :  { %v842_v22 = vpop.permute.xlu1 %841 }
0x1581   :  { %1074 = vmatmul.mubr.msk.f32.vlgmr.msra.gmra.mrb[8].mxu0 %vm134_vm4, %v842_v22 }
0x1654   :  { %v911_v7 = vpop.f32.mrb[8].mxu0 }
0x1655   :  { %v912_v36 = vadd.f32 %v911_v7, %v1226_v6  ;;  %v1075_v37 = vpop.f32.mrb[9].mxu0 }
0x1657   :  { %1175 = vtanh.f32 %v912_v36  ;;  %v987_v39 = vmul.f32 -1.442695, %v912_v36 }
0x1659   :  { %1177 = vpow2.f32 %v987_v39 }
0x1661   :  { %v1176_v38 = vpop.eup %1175 }
0x1662   :  { %924 = vrot.lane.b32.xlu0 %v1176_v38, %s1183_s0 }
0x1663   :  { %v1178_v40 = vpop.eup %1177 }
0x1664   :  { %v918_v41 = vadd.f32 1.0, %v1178_v40 }
0x1666   :  { %1179 = vrcp.f32 %v918_v41 }
0x1670   :  { %v1180_v42 = vpop.eup %1179 }
0x1671   :  { %v922_v6 = vmul.f32 %v1180_v42, %v833_v26 }
0x16d4   :  { %v925_v43 = vpop.permute.xlu0 %924 }
0x16d5   :  { %v927_v44 = vmul.f32 %v1180_v42, %v925_v43 }
0x16d7   :  { %929 = vrot.lane.b32.xlu1 %v927_v44, %s1188_s19 }
0x16db   :  { %945 = vrot.lane.b32.xlu1 %v943_v46, %s1191_s22 }
0x1749   :  { %v930_v47 = vpop.permute.xlu1 %929 }
0x174a   :  { %v932_v48 = vadd.f32 %v930_v47, %v922_v6 }
0x174c   :  { %1181 = vtanh.f32 %v932_v48 }
0x174d   :  { %v946_v52 = vpop.permute.xlu1 %945 }
0x1756   :  { %v1182_v49 = vpop.eup %1181 }
0x1757   :  { %935 = vrot.lane.b32.xlu0 %v1182_v49, %s1190_s21 }
0x17c9   :  { %v936_v50 = vpop.permute.xlu0 %935 }
0x17ca   :  { %v938_v51 = vmul.f32 %v1180_v42, %v936_v50 }
0x17cc   :  { %v939_v53 = vmax.f32 %v938_v51, 0.0 }
0x17ce   :  { %v948_v54 = vmul.f32 %v946_v52, %v939_v53 }
0x17d0   :  { %950 = vrot.lane.b32.xlu0 %v948_v54, %s1192_s23 }
0x1842   :  { %v951_v4 = vpop.permute.xlu0 %950 }
0x1843   :  { %v954_v55 = vsel %vm953_vm5, %v951_v4, 0.0 }
0x1844   :  { %955 = vadd.xlane.f32.xlu1 %v954_v55 }
0x18d1   :  { %v956_v0 = vpop.xlane.xlu1 %955 }
0x18d2   :  { %v957_v56 = vadd.f32 %v956_v0, %v943_v46 }
0x18d4   :  { %959 = vrot.lane.b32.xlu0 %v957_v56, %s1193_s24 }
0x1946   :  { %v960_v57 = vpop.permute.xlu0 %959 }
0x1947   :  { %963 = vst.msk [vmem:[%s1336_s2] sm:$0x3] %vm962_vm6, %v960_v57 }

</bundles_post_ra>
